<compile_context>
chip_gen: v6e
topology: v6e:2x2x1
jax: 0.10.0
libtpu: 0.0.40
codegen_flags: <defaults>
</compile_context>

<pallas_src>
import functools

import jax
import jax.numpy as jnp
from jax.experimental import pallas as pl
from jax.experimental.pallas import tpu as pltpu


def _round_up(n, m):
    return ((n + m - 1) // m) * m


def _disc_kernel(x_ref, w1_ref, b1_ref, w2_ref, y_ref, acc_ref, *,
                 batch, tile_b, tiles_per_core, any_partial, use_bf16):
    c = pl.program_id(0)          # TensorCore split of the batch (v7x megacore)
    i = pl.program_id(1)          # batch-tile index within this core

    @pl.when(i == 0)
    def _init():
        acc_ref[...] = jnp.zeros_like(acc_ref)

    # Layer 1: (tile_b, num_inputs) @ (num_inputs, hid_pad) on the MXU, f32 accumulate.
    # x arrives in its native dtype; the (optional) bf16 cast rides free VPU slack.
    xa = x_ref[...]
    if use_bf16:
        xa = xa.astype(jnp.bfloat16)
    h = jnp.dot(xa, w1_ref[...], preferred_element_type=jnp.float32)
    h = jnp.maximum(h + b1_ref[...], 0.0)

    def _accumulate(hv):
        # (tile_b, hid) -> (tile_b//8, 8, hid): leading-axis sum is per-vreg VPU adds only;
        # the single cross-sublane reduce is deferred out of the hot loop (to the wrapper).
        acc_ref[...] += jnp.sum(hv.reshape(tile_b // 8, 8, hv.shape[-1]), axis=0)

    if any_partial:
        row_start = (c * tiles_per_core + i) * tile_b   # UNclamped global row offset
        overhangs = row_start + tile_b > batch          # dynamic: only edge tiles pay the mask

        @pl.when(jnp.logical_not(overhangs))
        def _full_tile():
            _accumulate(h)

        @pl.when(overhangs)
        def _edge_tile():
            # Rows past the true batch (partial last tile / clamped duplicate tile) would
            # otherwise contribute ReLU(garbage@W1 + b1) to the mean -> zero them.
            row = jax.lax.broadcasted_iota(jnp.int32, h.shape, 0) + row_start
            _accumulate(jnp.where(row < batch, h, 0.0))
    else:
        _accumulate(h)

    @pl.when(i == pl.num_programs(1) - 1)
    def _finalize():
        # Layer 2 once per core on the (8, hid_pad) sublane partials; /batch folded in here.
        part = jnp.dot(acc_ref[...], w2_ref[...], preferred_element_type=jnp.float32)
        y_ref[...] = (part * (1.0 / batch))[None]       # (1, 8, out_pad), lane-dense store


def discriminator_forward(x, w1, b1, w2, b2, *, tile_b=None, use_bf16=True):
    """x: [B, num_inputs]; w1: [num_inputs, hidden]; b1: [hidden];
    w2: [hidden, num_outputs]; b2: [num_outputs].  Returns [num_outputs] f32.

    use_bf16=True casts x / W1 to bf16 for the layer-1 MXU operands (not bit-exact vs an
    f32 reference; fine for a GAN discriminator).  Set use_bf16=False for full f32."""
    B, num_inputs = x.shape
    hidden = w1.shape[1]
    num_outputs = w2.shape[1]

    hid_pad = _round_up(hidden, 128)
    out_pad = _round_up(num_outputs, 128)

    # --- batch tile from a VMEM byte budget (x streamed in native dtype) -----------------
    itemsize = jnp.dtype(x.dtype).itemsize
    bytes_per_row = num_inputs * itemsize
    if tile_b is None:
        tile_b = (2 << 20) // max(bytes_per_row, 1)       # target ~2 MiB per x buffer
        tile_b = max(256, min(tile_b, 2048))
    # keep double-buffered x tiles well inside the smallest VMEM (v7x: 64 MiB per core)
    max_rows = max(64, (12 << 20) // max(bytes_per_row, 1))
    tile_b = min(tile_b, max_rows, _round_up(B, 8))
    tile_b = max(8, (tile_b // 8) * 8)

    grid_b = pl.cdiv(B, tile_b)             # total batch tiles (no x padding in HBM)
    tiles_per_core = pl.cdiv(grid_b, 2)     # leading size-2 "parallel" axis
    any_partial = (B % tile_b != 0) or (grid_b % 2 != 0)

    # --- weights / biases: zero-pad hidden/outputs to 128 lanes (numerically exact) ------
    w1_p = jnp.pad(w1, ((0, 0), (0, hid_pad - hidden)))
    if use_bf16:
        w1_p = w1_p.astype(jnp.bfloat16)    # W1 is tiny & fetched once; one-time cast is fine
    b1_p = jnp.pad(b1, (0, hid_pad - hidden)).reshape(1, hid_pad).astype(jnp.float32)
    w2_p = jnp.pad(w2, ((0, hid_pad - hidden), (0, out_pad - num_outputs))).astype(jnp.float32)

    def x_map(c, i):
        # Clamp so the duplicate tile of an odd tile-count stays in-bounds; its rows are
        # fully masked in-kernel (row_start uses the UNclamped index).
        return (jnp.minimum(c * tiles_per_core + i, grid_b - 1), 0)

    # Explicit scoped-VMEM limit (defaults: 16 MiB v5e / 32 MiB v6e,v7x); capped at 48 MiB
    # to leave headroom on v7x's 64 MiB physical VMEM.
    need = (2 * tile_b * num_inputs * itemsize                        # double-buffered x
            + 2 * num_inputs * hid_pad * (2 if use_bf16 else 4)       # W1 (fetched once)
            + 2 * (hid_pad * 4 + hid_pad * out_pad * 4)               # b1, W2
            + 2 * 8 * out_pad * 4 + 8 * hid_pad * 4)                  # out + scratch
    vmem_limit = int(min(max(int(need * 1.5) + (2 << 20), 32 << 20), 48 << 20))

    kernel = functools.partial(
        _disc_kernel, batch=B, tile_b=tile_b, tiles_per_core=tiles_per_core,
        any_partial=any_partial, use_bf16=use_bf16)

    y_parts = pl.pallas_call(
        kernel,
        out_shape=jax.ShapeDtypeStruct((2, 8, out_pad), jnp.float32),
        grid_spec=pltpu.PrefetchScalarGridSpec(
            num_scalar_prefetch=0,
            grid=(2, tiles_per_core),
            in_specs=[
                # streamed batch tiles of x (native dtype; no wrapper pad / cast passes)
                pl.BlockSpec((tile_b, num_inputs), x_map),
                # weights / biases: constant index_map -> DMA'd once, VMEM-resident
                pl.BlockSpec((num_inputs, hid_pad), lambda c, i: (0, 0)),
                pl.BlockSpec((1, hid_pad), lambda c, i: (0, 0)),
                pl.BlockSpec((hid_pad, out_pad), lambda c, i: (0, 0)),
            ],
            out_specs=pl.BlockSpec((1, 8, out_pad), lambda c, i: (c, 0, 0)),
            scratch_shapes=[pltpu.VMEM((8, hid_pad), jnp.float32)],
        ),
        compiler_params=pltpu.CompilerParams(
            # inner axis is a reduction into a resident accumulator ("arbitrary");
            # the size-2 core axis is independent -> sharded across TCs on v7x.
            dimension_semantics=("parallel", "arbitrary"),
            vmem_limit_bytes=vmem_limit,
        ),
    )(x, w1_p, b1_p, w2_p)

    # Tiny final combine: sum the 2-core x 8-sublane partials, strip lane padding, add b2.
    y = jnp.sum(y_parts, axis=(0, 1))
    return y[:num_outputs] + b2.astype(jnp.float32)


def init_params(key, num_inputs, num_outputs, hidden=100):
    """Deterministic init mimicking nn.Linear (uniform +/- 1/sqrt(fan_in)).
    Weights returned already transposed to [in, out]."""
    k1, k2, k3, k4 = jax.random.split(key, 4)
    bound1 = 1.0 / (num_inputs ** 0.5)
    bound2 = 1.0 / (hidden ** 0.5)
    w1 = jax.random.uniform(k1, (num_inputs, hidden), jnp.float32, -bound1, bound1)
    b1 = jax.random.uniform(k2, (hidden,), jnp.float32, -bound1, bound1)
    w2 = jax.random.uniform(k3, (hidden, num_outputs), jnp.float32, -bound2, bound2)
    b2 = jax.random.uniform(k4, (num_outputs,), jnp.float32, -bound2, bound2)
    return w1, b1, w2, b2


def _reference(x, w1, b1, w2, b2):
    h = jnp.maximum(x @ w1 + b1, 0.0)
    return jnp.mean(h @ w2 + b2, axis=0)


if __name__ == "__main__":
    key = jax.random.PRNGKey(0)

    # ---- small demo shapes consistent with the module ----
    k_in, k_par = jax.random.split(key)
    B, num_inputs, num_outputs = 8, 32, 4
    x = jax.random.normal(k_in, (B, num_inputs), jnp.float32)
    w1, b1, w2, b2 = init_params(k_par, num_inputs, num_outputs)

    y = discriminator_forward(x, w1, b1, w2, b2)
    jax.block_until_ready(y)
    y_ref = _reference(x, w1, b1, w2, b2)
    assert y.shape == (num_outputs,)
    assert jnp.allclose(y, y_ref, atol=2e-2, rtol=2e-2), (y, y_ref)

    # ---- batch not a multiple of the tile (exercises 2-core grid, clamped index, masking) ----
    k_in2, k_par2 = jax.random.split(jax.random.PRNGKey(1))
    B2, ni2, no2 = 300, 64, 4
    x2 = jax.random.normal(k_in2, (B2, ni2), jnp.float32)
    p2 = init_params(k_par2, ni2, no2)
    y2 = discriminator_forward(x2, *p2, tile_b=128)
    jax.block_until_ready(y2)
    y2_ref = _reference(x2, *p2)
    assert y2.shape == (no2,)
    assert jnp.allclose(y2, y2_ref, atol=2e-2, rtol=2e-2), (y2, y2_ref)

    # ---- full-f32 path (use_bf16 switch) ----
    y3 = discriminator_forward(x2, *p2, tile_b=128, use_bf16=False)
    jax.block_until_ready(y3)
    assert jnp.allclose(y3, y2_ref, atol=2e-2, rtol=2e-2), (y3, y2_ref)

    print("KERNEL_OK")
</pallas_src>

<mosaic_0001>
module attributes {stable_mosaic.version = 11 : i64} {
  func.func @_disc_kernel(%arg0: i32, %arg1: i32, %arg2: memref<8x32xf32, #tpu.memory_space<vmem>>, %arg3: memref<32x128xbf16, #tpu.memory_space<vmem>>, %arg4: memref<1x128xf32, #tpu.memory_space<vmem>>, %arg5: memref<128x128xf32, #tpu.memory_space<vmem>>, %arg6: memref<1x8x128xf32, #tpu.memory_space<vmem>>, %arg7: memref<8x128xf32, #tpu.memory_space<vmem>>) attributes {dimension_semantics = [#tpu.dimension_semantics<parallel>, #tpu.dimension_semantics<arbitrary>], iteration_bounds = array<i64: 2, 1>, scalar_prefetch = 0 : i64, scratch_operands = 1 : i64, tpu.core_type = #tpu.core_type<tc>, window_params = [{transform_indices = @transform_0, window_bounds = array<i64: 8, 32>}, {pipeline_mode = #tpu.pipeline_mode<synchronous>, transform_indices = @transform_1, window_bounds = array<i64: 32, 128>}, {pipeline_mode = #tpu.pipeline_mode<synchronous>, transform_indices = @transform_2, window_bounds = array<i64: 1, 128>}, {pipeline_mode = #tpu.pipeline_mode<synchronous>, transform_indices = @transform_3, window_bounds = array<i64: 128, 128>}, {transform_indices = @transform_4, window_bounds = array<i64: 1, 8, 128>}]} {
    %c0_i32 = arith.constant 0 : i32
    %0 = arith.cmpi eq, %arg1, %c0_i32 : i32
    %1 = arith.extui %0 : i1 to i32
    %c0_i32_0 = arith.constant 0 : i32
    %2 = arith.cmpi ne, %1, %c0_i32_0 : i32
    scf.if %2 {
      %cst_13 = arith.constant 0.000000e+00 : f32
      %25 = vector.broadcast %cst_13 : f32 to vector<8x128xf32>
      %c0_14 = arith.constant 0 : index
      %c0_15 = arith.constant 0 : index
      %26 = vector.load %arg7[%c0_14, %c0_15] : memref<8x128xf32, #tpu.memory_space<vmem>>, vector<8x128xf32>
      tpu.vector_store %arg7[%c0_14, %c0_15], %25 {strides = array<i32>} : memref<8x128xf32, #tpu.memory_space<vmem>>, vector<8x128xf32>,
    } else {
    }
    %c0 = arith.constant 0 : index
    %c0_1 = arith.constant 0 : index
    %3 = vector.load %arg2[%c0, %c0_1] : memref<8x32xf32, #tpu.memory_space<vmem>>, vector<8x32xf32>
    %4 = arith.truncf %3 : vector<8x32xf32> to vector<8x32xbf16>
    %c0_2 = arith.constant 0 : index
    %c0_3 = arith.constant 0 : index
    %5 = vector.load %arg3[%c0_2, %c0_3] : memref<32x128xbf16, #tpu.memory_space<vmem>>, vector<32x128xbf16>
    %cst = arith.constant dense<0.000000e+00> : vector<8x128xf32>
    %6 = tpu.matmul %4, %5, %cst {dimension_numbers = #tpu.dot_dimension_numbers<[1], [0], [0], [1], [0, 0, 1, 1], [], []>} : vector<8x32xbf16>, vector<32x128xbf16>, vector<8x128xf32> -> vector<8x128xf32>
    %c0_4 = arith.constant 0 : index
    %c0_5 = arith.constant 0 : index
    %7 = vector.load %arg4[%c0_4, %c0_5] : memref<1x128xf32, #tpu.memory_space<vmem>>, vector<1x128xf32>
    %8 = vector.broadcast %7 : vector<1x128xf32> to vector<8x128xf32>
    %9 = arith.addf %6, %8 : vector<8x128xf32>
    %cst_6 = arith.constant 0.000000e+00 : f32
    %10 = vector.broadcast %cst_6 : f32 to vector<8x128xf32>
    %11 = arith.maximumf %9, %10 : vector<8x128xf32>
    %c1_i32 = arith.constant 1 : i32
    %12 = arith.muli %arg0, %c1_i32 : i32
    %13 = arith.addi %12, %arg1 : i32
    %c8_i32 = arith.constant 8 : i32
    %14 = arith.muli %13, %c8_i32 : i32
    %c8_i32_7 = arith.constant 8 : i32
    %15 = arith.addi %14, %c8_i32_7 : i32
    %c8_i32_8 = arith.constant 8 : i32
    %16 = arith.cmpi sgt, %15, %c8_i32_8 : i32
    %true = arith.constant true
    %17 = arith.xori %16, %true : i1
    %18 = arith.extui %17 : i1 to i32
    %c0_i32_9 = arith.constant 0 : i32
    %19 = arith.cmpi ne, %18, %c0_i32_9 : i32
    scf.if %19 {
      %c0_13 = arith.constant 0 : index
      %c0_14 = arith.constant 0 : index
      %25 = vector.load %arg7[%c0_13, %c0_14] : memref<8x128xf32, #tpu.memory_space<vmem>>, vector<8x128xf32>
      %26 = vector.shape_cast %11 : vector<8x128xf32> to vector<1x8x128xf32>
      %cst_15 = arith.constant dense<0.000000e+00> : vector<8x128xf32>
      %27 = vector.multi_reduction <add>, %26, %cst_15 [0] : vector<1x8x128xf32> to vector<8x128xf32>
      %28 = arith.addf %25, %27 : vector<8x128xf32>
      %c0_16 = arith.constant 0 : index
      %c0_17 = arith.constant 0 : index
      %29 = vector.load %arg7[%c0_16, %c0_17] : memref<8x128xf32, #tpu.memory_space<vmem>>, vector<8x128xf32>
      tpu.vector_store %arg7[%c0_16, %c0_17], %28 {strides = array<i32>} : memref<8x128xf32, #tpu.memory_space<vmem>>, vector<8x128xf32>,
    } else {
    }
    %20 = arith.extui %16 : i1 to i32
    %c0_i32_10 = arith.constant 0 : i32
    %21 = arith.cmpi ne, %20, %c0_i32_10 : i32
    scf.if %21 {
      %25 = tpu.iota {dimensions = array<i32: 0>} : vector<8x128xi32>
      %26 = vector.broadcast %14 : i32 to vector<8x128xi32>
      %27 = arith.addi %25, %26 : vector<8x128xi32>
      %c8_i32_13 = arith.constant 8 : i32
      %28 = vector.broadcast %c8_i32_13 : i32 to vector<8x128xi32>
      %29 = arith.cmpi slt, %27, %28 : vector<8x128xi32>
      %cst_14 = arith.constant 0.000000e+00 : f32
      %30 = vector.broadcast %cst_14 : f32 to vector<8x128xf32>
      %31 = arith.select %29, %11, %30 : vector<8x128xi1>, vector<8x128xf32>
      %c0_15 = arith.constant 0 : index
      %c0_16 = arith.constant 0 : index
      %32 = vector.load %arg7[%c0_15, %c0_16] : memref<8x128xf32, #tpu.memory_space<vmem>>, vector<8x128xf32>
      %33 = vector.shape_cast %31 : vector<8x128xf32> to vector<1x8x128xf32>
      %cst_17 = arith.constant dense<0.000000e+00> : vector<8x128xf32>
      %34 = vector.multi_reduction <add>, %33, %cst_17 [0] : vector<1x8x128xf32> to vector<8x128xf32>
      %35 = arith.addf %32, %34 : vector<8x128xf32>
      %c0_18 = arith.constant 0 : index
      %c0_19 = arith.constant 0 : index
      %36 = vector.load %arg7[%c0_18, %c0_19] : memref<8x128xf32, #tpu.memory_space<vmem>>, vector<8x128xf32>
      tpu.vector_store %arg7[%c0_18, %c0_19], %35 {strides = array<i32>} : memref<8x128xf32, #tpu.memory_space<vmem>>, vector<8x128xf32>,
    } else {
    }
    %c0_i32_11 = arith.constant 0 : i32
    %22 = arith.cmpi eq, %arg1, %c0_i32_11 : i32
    %23 = arith.extui %22 : i1 to i32
    %c0_i32_12 = arith.constant 0 : i32
    %24 = arith.cmpi ne, %23, %c0_i32_12 : i32
    scf.if %24 {
      %c0_13 = arith.constant 0 : index
      %c0_14 = arith.constant 0 : index
      %25 = vector.load %arg7[%c0_13, %c0_14] : memref<8x128xf32, #tpu.memory_space<vmem>>, vector<8x128xf32>
      %c0_15 = arith.constant 0 : index
      %c0_16 = arith.constant 0 : index
      %26 = vector.load %arg5[%c0_15, %c0_16] : memref<128x128xf32, #tpu.memory_space<vmem>>, vector<128x128xf32>
      %cst_17 = arith.constant dense<0.000000e+00> : vector<8x128xf32>
      %27 = tpu.matmul %25, %26, %cst_17 {dimension_numbers = #tpu.dot_dimension_numbers<[1], [0], [0], [1], [0, 0, 1, 1], [], []>} : vector<8x128xf32>, vector<128x128xf32>, vector<8x128xf32> -> vector<8x128xf32>
      %cst_18 = arith.constant 1.250000e-01 : f32
      %28 = vector.broadcast %cst_18 : f32 to vector<8x128xf32>
      %29 = arith.mulf %27, %28 : vector<8x128xf32>
      %30 = vector.shape_cast %29 : vector<8x128xf32> to vector<1x8x128xf32>
      %c0_19 = arith.constant 0 : index
      %c0_20 = arith.constant 0 : index
      %c0_21 = arith.constant 0 : index
      %31 = vector.load %arg6[%c0_19, %c0_20, %c0_21] : memref<1x8x128xf32, #tpu.memory_space<vmem>>, vector<1x8x128xf32>
      tpu.vector_store %arg6[%c0_19, %c0_20, %c0_21], %30 {strides = array<i32>} : memref<1x8x128xf32, #tpu.memory_space<vmem>>, vector<1x8x128xf32>,
    } else {
    }
    return
  }
  func.func @transform_0(%arg0: i32, %arg1: i32) -> (i32, i32) {
    %c1_i32 = arith.constant 1 : i32
    %0 = arith.muli %arg0, %c1_i32 : i32
    %1 = arith.addi %0, %arg1 : i32
    %c0_i32 = arith.constant 0 : i32
    %2 = arith.minsi %1, %c0_i32 : i32
    %c0_i32_0 = arith.constant 0 : i32
    %c0_i32_1 = arith.constant 0 : i32
    return %2, %c0_i32_0 : i32, i32
  }
  func.func @transform_1(%arg0: i32, %arg1: i32) -> (i32, i32) {
    %c0_i32 = arith.constant 0 : i32
    %c0_i32_0 = arith.constant 0 : i32
    %c0_i32_1 = arith.constant 0 : i32
    return %c0_i32, %c0_i32_0 : i32, i32
  }
  func.func @transform_2(%arg0: i32, %arg1: i32) -> (i32, i32) {
    %c0_i32 = arith.constant 0 : i32
    %c0_i32_0 = arith.constant 0 : i32
    %c0_i32_1 = arith.constant 0 : i32
    return %c0_i32, %c0_i32_0 : i32, i32
  }
  func.func @transform_3(%arg0: i32, %arg1: i32) -> (i32, i32) {
    %c0_i32 = arith.constant 0 : i32
    %c0_i32_0 = arith.constant 0 : i32
    %c0_i32_1 = arith.constant 0 : i32
    return %c0_i32, %c0_i32_0 : i32, i32
  }
  func.func @transform_4(%arg0: i32, %arg1: i32) -> (i32, i32, i32) {
    %c0_i32 = arith.constant 0 : i32
    %c0_i32_0 = arith.constant 0 : i32
    %c0_i32_1 = arith.constant 0 : i32
    return %arg0, %c0_i32, %c0_i32_0 : i32, i32, i32
  }
}

</mosaic_0001>

<bundles_post_ra>
// kernel: tpu_custom_call.1
= control target key start
LH: loop header
LB: loop body
LE: loop exit
PB: predicated region body
PF: predicated region fallthrough
CT: control target
= control target key end

     0   :  { %9 = vsyncpa [#allocation4], 0  ;;  %s1219_s0 = inlined_call_operand.hbm [shape: f32[8,32], index: 0, kind: input, shape index: {}]   ;;  %s1220_s1 = inlined_call_operand.hbm [shape: bf16[32,128], index: 1, kind: input, shape index: {}]   ;;  %s1221_s2 = inlined_call_operand.vmem [shape: f32[1,128], index: 2, kind: input, shape index: {}]   ;;  %s1222_s3 = inlined_call_operand.hbm [shape: f32[128,128], index: 3, kind: input, shape index: {}]   ;;  %s1223_s4 = inlined_call_operand.hbm [shape: f32[2,8,128], index: 4, kind: output, shape index: {}]  }
   0x1   :  { %11 = vsyncpa [#allocation4 + $0x1], 0 }
   0x2   :  { %12 = vsyncpa [#allocation7], 0 }
   0x3   :  { %13 = vsyncpa [#allocation5], 0 }
   0x4   :  { %15 = vsyncpa [#allocation5 + $0x1], 0  ;;  %s994_s15 = smov 0   ;;  %s996_s16 = smov 0  }
   0x5   :  { %s998_s17 = smov 0   ;;  %s1000_s18 = smov 0  }
   0x6   :  { %s1002_s19 = smov 0   ;;  %s1004_s20 = smov 0  }
   0x7   :  { %s1006_s21 = smov 0   ;;  %s1008_s22 = smov 0  }
   0x8 LB: > { %s570_s23 = sadd.s32 4294967295, %s957_s22   ;;  %s571_s24 = sadd.s32 4294967294, %s957_s22   ;;  %s957_s22 = sphi %s1008_s22, %s21_s22   ;;  %s953_s21 = sphi %s1006_s21, %s1247_s21   ;;  %s949_s20 = sphi %s1004_s20, %s1246_s20   ;;  %s945_s19 = sphi %s1002_s19, %s1209_s19   ;;  %s941_s18 = sphi %s1000_s18, %s1245_s18   ;;  %s937_s17 = sphi %s998_s17, %s1244_s17   ;;  %s933_s16 = sphi %s996_s16, %s1243_s16   ;;  %s929_s15 = sphi %s994_s15, %s1242_s15  }
   0x9   : > { %p59_p0 = scmp.ne.s32.totalorder %s945_s19, %s941_s18  ;;  %p1035_p1 = scmp.eq.s32.totalorder %s570_s23, 0 }
   0xa   : > { %p145_p2 = scmp.ne.s32.totalorder %s937_s17, %s933_s16  ;;  %p146_p3 = scmp.eq.s32.totalorder %s570_s23, 1 }
   0xb   : > { %s1229_s25 = scalar_select %p1035_p1, 1, 0 }
   0xc   : > { %p1043_p4 = por %p1035_p1, %p59_p0  ;;  %p151_p5 = scmp.ne.s32.totalorder %s933_s16, %s929_s15 }
   0xd   : > { %p1049_p6 = por %p146_p3, %p145_p2  ;;  %p152_p7 = scmp.eq.s32.totalorder %s571_s24, 1 }
   0xe   : > { %s1230_s26 = scalar_select %p1043_p4, 1, 0 }
   0xf   : > { %s1231_s27 = scalar_select %p1049_p6, 1, 0 }
  0x10   : > { %p572_p8 = scmp.ge.s32.totalorder %s957_s22, 1  ;;  %p159_p9 = scmp.lt.s32.totalorder %s957_s22, 3 }
  0x11   : > { %p1055_p10 = por %p152_p7, %p151_p5  ;;  %s959_s30 = smov [#allocation6]  }
  0x12   : > { %p1059_p11 = pnand %p572_p8, %p159_p9  ;;  %s171_s5 = sshll.u32 %s959_s30, 4  ;;  %s172_s5 = int_to_ptr.vmem [resolvable:$true] %s171_s5 }
  0x13   : > { %s1232_s28 = scalar_select %p1055_p10, 1, 0 }
  0x14   : > { %s1233_s29 = scalar_select %p1059_p11, 1, 0 }
  0x15   : > { %p669_p12 = pneg %p1059_p11  ;;  %s960_s7 = smov [#allocation8]  }
  0x16   : > { %s187_s8 = sshll.u32 %s960_s7, 4  ;;  %s783_s9 = scalar_lea.vmem %s172_s5, 256  ;;  %s188_s8 = int_to_ptr.vmem [resolvable:$true] %s187_s8 }
  0x17   : > { %p1068_p0 = pnand %p669_p12, %p1035_p1  ;;  %p784_p3 = scmp.ne.s32.totalorder %s172_s5, %s783_s9 }
  0x18   : > { %p791_p8 = scmp.lt.s32.totalorder %s172_s5, %s172_s5  ;;  %p792_p9 = scmp.lt.s32.totalorder %s783_s9, %s783_s9 }
  0x19   : > { %p774_p2 = pneg %p1068_p0 }
  0x1a   : > { %p793_p13 = por %p792_p9, %p791_p8 }
  0x1b   : > { %p786_p5 = pnand %p784_p3, %p774_p2 }
  0x1d   : > { %p787_p7 = pneg %p786_p5 }
  0x1f   : > { %p794_p12 = pnand %p793_p13, %p787_p7 }
  0x21   : > { %797 = shalt.err (!%p794_p12)
}
  0x22   : > { %s961_s10 = smov 64   ;;  %s962_s11 = smov 4  }
  0x23   : > { %672 = dma.hbm_to_vmem [thread:$0]  (!%p1068_p0), %s1220_s1, 256, %s172_s5, [#allocation7], %s961_s10, %s961_s10, %s962_s11  }
  0x24   : > { %s809_s14 = scalar_lea.vmem %s188_s8, 2048  ;;  %p817_p6 = scmp.lt.s32.totalorder %s188_s8, %s188_s8 }
  0x25   : > { %p810_p10 = scmp.ne.s32.totalorder %s188_s8, %s809_s14  ;;  %p818_p1 = scmp.lt.s32.totalorder %s809_s14, %s809_s14 }
  0x27   : > { %p812_p3 = pnand %p810_p10, %p774_p2  ;;  %p819_p8 = por %p818_p1, %p817_p6 }
  0x29   : > { %p813_p5 = pneg %p812_p3 }
  0x2b   : > { %p820_p13 = pnand %p819_p8, %p813_p5 }
  0x2d   : > { %823 = shalt.err (!%p820_p13)
}
  0x2e   : > { %s963_s18 = smov 128   ;;  %s964_s23 = smov 8  }
  0x2f   : > { %675 = dma.hbm_to_vmem [thread:$0]  (!%p1068_p0), %s1222_s3, 2048, %s188_s8, [#allocation7], %s963_s18, %s963_s18, %s964_s23  }
  0x30   : > { %s33_s5 = sadd.s32 1, %s953_s21  ;;  %p926_p1 = scmp.ne.s32.totalorder %s945_s19, 0 }
  0x31   : > { %p35_p10 = scmp.ge.s32.totalorder %s33_s5, 2  ;;  %p54_p6 = scmp.eq.s32.totalorder %s957_s22, 0 }
  0x32   : > { %s135_s7 = sadd.s32 1, %s937_s17  ;;  %p686_p9 = scmp.lt.s32.totalorder %s957_s22, 2 }
  0x33   : > { %s1249_s5 = smov (%p35_p10, %s33_s5), 0  ;;  %p55_p2 = por %p926_p1, %p54_p6 }
  0x34   : > { %s132_s9 = ssub.s32 %s953_s21, %s1249_s5  ;;  %s965_s11 = smov [#allocation3]  }
  0x35   : > { %p133_p7 = scmp.eq.s32.totalorder %s132_s9, 0  ;;  %s215_s6 = sshll.u32 %s965_s11, 4  ;;  %s216_s6 = int_to_ptr.vmem [resolvable:$true] %s215_s6 }
  0x36   : > { %p1102_p12 = pnand %p686_p9, %p55_p2  ;;  %s824_s14 = scalar_lea.hbm %s1219_s0, 128 }
  0x37   : > { %s1099_s10 = scalar_select %p133_p7, %s937_s17, %s135_s7  }
  0x38   : > { %p825_p0 = scmp.ne.s32.totalorder %s1219_s0, %s824_s14  ;;  %p826_p3 = pneg %p1102_p12 }
  0x39   : > { %p831_p13 = scmp.lt.s32.totalorder %s824_s14, %s824_s14 }
  0x3a   : > { %p827_p5 = pnand %p826_p3, %p825_p0 }
  0x3c   : > { %p828_p8 = pneg %p827_p5 }
  0x3e   : > { %p833_p10 = pnand %p831_p13, %p828_p8 }
  0x40   : > { %836 = shalt.err (!%p833_p10)
}
  0x41   : > { %s837_s24 = scalar_lea.vmem %s216_s6, 128  ;;  %s844_s30 = scalar_lea.vmem %s216_s6, 256 }
  0x42   : > { %p838_p1 = scmp.ne.s32.totalorder %s216_s6, %s837_s24  ;;  %p845_p7 = scmp.lt.s32.totalorder %s216_s6, %s216_s6 }
  0x43   : > { %p846_p9 = scmp.lt.s32.totalorder %s844_s30, %s837_s24 }
  0x44   : > { %p840_p6 = pnand %p838_p1, %p826_p3 }
  0x45   : > { %p847_p4 = por %p846_p9, %p845_p7 }
  0x46   : > { %p841_p2 = pneg %p840_p6 }
  0x48   : > { %p848_p11 = pnand %p847_p4, %p841_p2 }
  0x4a   : > { %851 = shalt.err (!%p848_p11)
}
  0x4b   : > { %679 = dma.hbm_to_vmem [thread:$0]  (!%p1102_p12), %s1219_s0, 128, %s216_s6, [#allocation4]  }
  0x4c   : > { %p1236_p0 = scmp.ne.s32.totalorder %s1233_s29, 0 }
  0x4d   : > { %s226_s11 = sand.u32 (!%p1236_p0), 1, %s945_s19   ;;  %p1237_p3 = scmp.ne.s32.totalorder (!%p1236_p0), %s1230_s26, 0 }
  0x4e   : > { %224 = sbr.rel (%p1236_p0) target bundleno = 557 (0x22d), region = 36  ;;  %s579_s8 = sshll.u32 (!%p1236_p0), %s226_s11, 3 }
  0x4f   : > { %s227_s13 = scalar_lea.sflag (!%p1236_p0), [#allocation4], %s226_s11  ;;  %s230_s14 = scalar_lea.vmem (!%p1236_p0), [#allocation3], %s579_s8 }
  0x53   : > { %915 = dma.done.wait (%p1237_p3), %s227_s13, 128  }
  0x54   : > { %917 = vsyncadd (%p1237_p3), %s227_s13, 4294967168  ;;  %p1238_p4 = scmp.ne.s32.totalorder %s1229_s25, 0 }
  0x56   : > { %919 = dma.done.wait (%p1238_p4), [#allocation7], 2304  }
  0x57   : > { %921 = vsyncadd (%p1238_p4), [#allocation7], 4294964992  ;;  %s260_s29 = sand.u32 1, %s933_s16   ;;  %v966_v0 = vmov 0.0   ;;  %vm967_vm0 = vmmov 0   ;;  %v770_v1 = vld [vmem:[#allocation6 + $0x8] sm:$0xff]  }
  0x58   : > { %s1133_s6 = sshll.u32 %s260_s29, 3  ;;  %271 = vst [vmem:[#allocation2] sm:$0xff] %v966_v0  ;;  %614 = vmatprep.subr.bf16.mxu0 %v966_v0  ;;  %618 = vmatprep.mubr.msk.bf16.mxu0 %vm967_vm0, %v966_v0  ;;  %v771_v2 = vld [vmem:[#allocation6] sm:$0xff]   ;;  %v272_v3 = vld [vmem:[%s230_s14] sm:$0xff]  ;;  %vm297_vm1 = vcmask 261120   ;;  %s587_s25 = sshll.u32 %s949_s20, 3 }
  0x59   : > { %615 = vmatpush3.bf16.msra.mxu0 %v770_v1  ;;  %v273_v4 = vpack.c.bf16 %v272_v3, %v272_v3  ;;  %s344_s26 = sadd.s32 8, %s587_s25  ;;  %v583_v5 = vld [vmem:[%s1221_s2] ss:$0 sm:$0xff]  ;;  %s262_s23 = scalar_lea.vmem [#allocation9], %s1133_s6 }
  0x5a   : > { %616 = vmatprep.subr.bf16.mxu0 %v966_v0  ;;  %p588_p11 = scmp.gt.s32.totalorder %s344_s26, 8 }
  0x5d   : > { %617 = vmatpush3.bf16.msra.mxu0 %v771_v2 }
  0x60   : > { %619 = vmatmul.mubr.msk.bf16.vlgmr.msra.gmra.mxu0 %vm297_vm1, %v273_v4 }
 0x120   : > { %v335_v6 = vpop.f32.mrf.mxu0 }
 0x121   : > { %v336_v7 = vadd.f32 %v583_v5, %v335_v6 }
 0x122   : > { %v620_v8 = vpop.f32.mrf.mxu0  ;;  %349 = sbr.rel (%p588_p11) target bundleno = 299 (0x12b), region = 56 }
 0x123   : > { %v341_v9 = vmax.f32 %v336_v7, 0.0 }
 0x124   : > { %v338_v10 = vpop.f32.mrf.mxu0 }
 0x126   : > { %v621_v11 = vpop.f32.mrf.mxu0 }
 0x127   : > { %v350_v12 = vld [vmem:[#allocation2] sm:$0xff] }
 0x128   : > { %v352_v13 = vadd.f32 %v350_v12, %v341_v9 }
 0x12a   : > { %353 = vst [vmem:[#allocation2] sm:$0xff] %v352_v13 }
 0x12b PF: > { %p589_p12 = scmp.le.s32.totalorder %s344_s26, 8 }
 0x12d   : > { %356 = sbr.rel (%p589_p12) target bundleno = 317 (0x13d), region = 60 }
 0x132   : > { %v357_v14 = vlaneseq  ;;  %v359_v15 = vstv %s587_s25  ;;  %v363_v18 = vld [vmem:[#allocation2] sm:$0xff] }
 0x134   : > { %v358_v16 = vshrl.u32 %v357_v14, 7 }
 0x136   : > { %v360_v17 = vadd.s32 %v359_v15, %v358_v16 }
 0x138   : > { %vm361_vm2 = vcmp.lt.s32.totalorder %v360_v17, 8 }
 0x139   : > { %v362_v19 = vsel %vm361_vm2, %v341_v9, 0.0 }
 0x13a   : > { %v365_v20 = vadd.f32 %v363_v18, %v362_v19 }
 0x13c   : > { %366 = vst [vmem:[#allocation2] sm:$0xff] %v365_v20 }
 0x13d PF: > { %622 = vmatprep.subr.mxu1 %v966_v0  ;;  %v386_v21 = vld [vmem:[#allocation8 + $0x78] sm:$0xff]  ;;  %v385_v22 = vld [vmem:[#allocation8 + $0x70] sm:$0xff]  ;;  %654 = vmatprep.mubr.msk.f32.mxu1 %vm967_vm0, %v966_v0  ;;  %v384_v23 = vld [vmem:[#allocation8 + $0x68] sm:$0xff]  ;;  %s591_s24 = sshll.u32 %s949_s20, 7  ;;  %s473_s30 = sshll.u32 %s262_s23, 4  ;;  %s474_s30 = int_to_ptr.vmem [resolvable:$true] %s473_s30 }
 0x13e   : > { %623 = vmatpush3.msra.mxu1 %v386_v21  ;;  %v383_v24 = vld [vmem:[#allocation8 + $0x60] sm:$0xff]  ;;  %v382_v25 = vld [vmem:[#allocation8 + $0x58] sm:$0xff]  ;;  %v381_v26 = vld [vmem:[#allocation8 + $0x50] sm:$0xff]  ;;  %s1169_s11 = scalar_lea.hbm %s1223_s4, %s591_s24  ;;  %s460_s8 = scalar_lea.sflag [#allocation5], %s260_s29 }
 0x13f   : > { %624 = vmatprep.subr.mxu1 %v966_v0  ;;  %v380_v27 = vld [vmem:[#allocation8 + $0x48] sm:$0xff]  ;;  %v379_v28 = vld [vmem:[#allocation8 + $0x40] sm:$0xff]  ;;  %v378_v29 = vld [vmem:[#allocation8 + $0x38] sm:$0xff]  ;;  %s852_s13 = scalar_lea.vmem %s474_s30, 128  ;;  %p1239_p8 = scmp.ne.s32.totalorder %s1231_s27, 0 }
 0x140   : > { %625 = vmatpush3.msra.mxu1 %v385_v22  ;;  %v377_v30 = vld [vmem:[#allocation8 + $0x30] sm:$0xff]  ;;  %v376_v31 = vld [vmem:[#allocation8 + $0x28] sm:$0xff]  ;;  %v375_v32 = vld [vmem:[#allocation8 + $0x20] sm:$0xff]  ;;  %p853_p5 = scmp.ne.s32.totalorder %s474_s30, %s852_s13  ;;  %s968_s20 = smov [#allocation9]  }
 0x141   : > { %626 = vmatprep.subr.mxu1 %v966_v0  ;;  %v374_v33 = vld [vmem:[#allocation8 + $0x18] sm:$0xff]  ;;  %v373_v34 = vld [vmem:[#allocation8 + $0x10] sm:$0xff]  ;;  %v372_v35 = vld [vmem:[#allocation8 + $0x8] sm:$0xff]  ;;  %s856_s14 = sshll.u32 %s968_s20, 4  ;;  %s857_s14 = int_to_ptr.vmem [resolvable:$false] %s856_s14 }
 0x142   : > { %627 = vmatpush3.msra.mxu1 %v384_v23  ;;  %v371_v36 = vld [vmem:[#allocation8] sm:$0xff]  ;;  %p854_p13 = pnand %p853_p5, %p1239_p8  ;;  %s858_s25 = scalar_lea.vmem %s857_s14, 256 }
 0x143   : > { %628 = vmatprep.subr.mxu1 %v966_v0  ;;  %v370_v37 = vld [vmem:[#allocation2] sm:$0xff]  ;;  %p859_p1 = scmp.lt.s32.totalorder %s474_s30, %s857_s14  ;;  %p860_p6 = scmp.lt.s32.totalorder %s858_s25, %s852_s13 }
 0x144   : > { %629 = vmatpush3.msra.mxu1 %v383_v24  ;;  %p855_p10 = pneg %p854_p13 }
 0x145   : > { %630 = vmatprep.subr.mxu1 %v966_v0  ;;  %p861_p2 = por %p860_p6, %p859_p1 }
 0x146   : > { %631 = vmatpush3.msra.mxu1 %v382_v25 }
 0x147   : > { %632 = vmatprep.subr.mxu1 %v966_v0  ;;  %p862_p7 = pnand %p861_p2, %p855_p10 }
 0x148   : > { %633 = vmatpush3.msra.mxu1 %v381_v26 }
 0x149   : > { %634 = vmatprep.subr.mxu1 %v966_v0 }
 0x14a   : > { %635 = vmatpush3.msra.mxu1 %v380_v27 }
 0x14b   : > { %636 = vmatprep.subr.mxu1 %v966_v0 }
 0x14c   : > { %637 = vmatpush3.msra.mxu1 %v379_v28 }
 0x14d   : > { %638 = vmatprep.subr.mxu1 %v966_v0 }
 0x14e   : > { %639 = vmatpush3.msra.mxu1 %v378_v29 }
 0x14f   : > { %640 = vmatprep.subr.mxu1 %v966_v0 }
 0x150   : > { %641 = vmatpush3.msra.mxu1 %v377_v30 }
 0x151   : > { %642 = vmatprep.subr.mxu1 %v966_v0 }
 0x152   : > { %643 = vmatpush3.msra.mxu1 %v376_v31 }
 0x153   : > { %644 = vmatprep.subr.mxu1 %v966_v0 }
 0x154   : > { %645 = vmatpush3.msra.mxu1 %v375_v32 }
 0x155   : > { %646 = vmatprep.subr.mxu1 %v966_v0 }
 0x156   : > { %647 = vmatpush3.msra.mxu1 %v374_v33 }
 0x157   : > { %648 = vmatprep.subr.mxu1 %v966_v0 }
 0x158   : > { %649 = vmatpush3.msra.mxu1 %v373_v34 }
 0x159   : > { %650 = vmatprep.subr.mxu1 %v966_v0 }
 0x15a   : > { %651 = vmatpush3.msra.mxu1 %v372_v35 }
 0x15b   : > { %652 = vmatprep.subr.mxu1 %v966_v0 }
 0x15c   : > { %653 = vmatpush3.msra.mxu1 %v371_v36 }
 0x15d   : > { %655 = vmatmul.mubr.f32.vlgmr.msra.gmra.mxu1 %v370_v37 }
 0x21d   : > { %v453_v38 = vpop.f32.mrf.mxu1 }
 0x21e   : > { %v457_v39 = vmul.f32 0.125, %v453_v38 }
 0x21f   : > { %v656_v40 = vpop.f32.mrf.mxu1 }
 0x220   : > { %458 = vst [vmem:[%s262_s23] sm:$0xff] %v457_v39 }
 0x221   : > { %865 = shalt.err (!%p862_p7)
}
 0x222   : > { %s866_s6 = scalar_lea.hbm %s1169_s11, 128  ;;  %s870_s12 = scalar_lea.hbm %s1223_s4, 256 }
 0x223   : > { %p867_p9 = scmp.ne.s32.totalorder %s1169_s11, %s866_s6  ;;  %p871_p4 = scmp.lt.s32.totalorder %s1169_s11, %s1223_s4 }
 0x224   : > { %p872_p11 = scmp.lt.s32.totalorder %s870_s12, %s866_s6 }
 0x225   : > { %p868_p0 = pnand %p867_p9, %p1239_p8 }
 0x226   : > { %p873_p12 = por %p872_p11, %p871_p4 }
 0x227   : > { %p869_p3 = pneg %p868_p0 }
 0x229   : > { %p874_p5 = pnand %p873_p12, %p869_p3 }
 0x22b   : > { %877 = shalt.err (!%p874_p5)
}
 0x22c   : > { %667 = dma.vmem_to_hbm [thread:$0]  (%p1239_p8), %s474_s30, 128, %s1169_s11, %s460_s8  }
 0x22d PF: > { %s485_s24 = sand.u32 1, %s929_s15   ;;  %p1240_p13 = scmp.ne.s32.totalorder %s1232_s28, 0 }
 0x22e   : > { %p1241_p10 = scmp.ge.s32.totalorder %s957_s22, 2  ;;  %s486_s7 = scalar_lea.sflag [#allocation5], %s485_s24 }
 0x230   : > { %p681_p1 = pnand %p1241_p10, %p1240_p13 }
 0x232   : > { %p682_p6 = pneg %p681_p1 }
 0x234   : > { %923 = dma.done.wait (%p682_p6), %s486_s7, 128  }
 0x235   : > { %925 = vsyncadd (%p682_p6), %s486_s7, 4294967168  ;;  %s21_s22 = sadd.s32 1, %s957_s22   ;;  %s1242_s15 = smov %s933_s16 }
 0x236   : > { %p18_p2 = scmp.ge.s32.totalorder %s21_s22, 4   ;;  %s1243_s16 = smov %s937_s17 }
 0x237   : > { %s1244_s17 = smov %s1099_s10  ;;  %s1245_s18 = smov %s945_s19 }
 0x238   : > { %s1209_s19 = smov 0   ;;  %s1246_s20 = smov %s953_s21 }
 0x239   : > { %s1247_s21 = smov %s1249_s5  ;;  %20 = sbr.rel (!%p18_p2) target bundleno = 8 (0x8), region = 105 }
 0x23e   :  { %491 = vsyncpa [#allocation4], 1 }
 0x23f   :  { %493 = vsyncpa [#allocation4 + $0x1], 1 }
 0x240   :  { %494 = vsyncpa [#allocation7], 1 }
 0x241   :  { %495 = vsyncpa [#allocation5], 1 }
 0x242   :  { %497 = vsyncpa [#allocation5 + $0x1], 1 }

</bundles_post_ra>
